<compile_context>
chip_gen: v6e
topology: v6e:2x2x1
jax: 0.10.0
libtpu: 0.0.40
codegen_flags: <defaults>
</compile_context>

<pallas_src>
import functools

import jax
import jax.numpy as jnp
import numpy as np
from jax.experimental import pallas as pl
from jax.experimental.pallas import tpu as pltpu


def _round_up(x, m):
    return ((x + m - 1) // m) * m


def _cdiv(a, b):
    return (a + b - 1) // b


def _edge_scatter_kernel(idx_ref, w_ref, traffic_ref, part_ref, *, n):
    """One edge tile: gather diffs, compute transfers, accumulate node delta."""
    t = pl.program_id(1)

    @pl.when(t == 0)
    def _():
        part_ref[...] = jnp.zeros_like(part_ref)

    Np = traffic_ref.shape[1]
    TE = idx_ref.shape[1]

    src = idx_ref[0:1, :]                      # (1, TE) int32, edges on lanes
    dst = idx_ref[1:2, :]                      # (1, TE) int32
    w = w_ref[...]                             # (1, TE) f32

    # Signed one-hot (nodes x edges): 2 compares + 2 selects (full-tile VPU).
    node_iota = jax.lax.broadcasted_iota(jnp.int32, (Np, TE), 0)
    s_t = jnp.where(node_iota == src, 1.0,
                    jnp.where(node_iota == dst, -1.0, 0.0))       # (Np, TE)

    # Gather: diff[e] = traffic[src_e] - traffic[dst_e]   (MXU, M = 1).
    diff = jnp.dot(traffic_ref[...], s_t,
                   preferred_element_type=jnp.float32)            # (1, TE)

    # Both torch branches: src loses |diff|*n*w, dst gains it.  Self-loops
    # and zero-padded edges (src == dst) must contribute nothing (the nested
    # where leaves a stray +1 there), so mask the per-edge transfer (O(TE)).
    transfer = jnp.where(src != dst, jnp.abs(diff) * (w * n), 0.0)  # (1, TE)

    # Scatter: delta[j] = sum_e s_t[j, e] * transfer[e].  s_t is a standard
    # MXU LHS; only the skinny transfer column / delta row get relayouted.
    delta = jnp.dot(s_t, transfer.T,
                    preferred_element_type=jnp.float32)            # (Np, 1)
    part_ref[...] = part_ref[...] - delta.T.reshape(1, 1, Np)


def _finalize_kernel(part_ref, traffic_ref, yield_ref, cost_ref,
                     new_traffic_ref, eff_ref):
    """Combine per-core partial deltas, add base traffic, compute efficiency."""
    delta = jnp.sum(part_ref[...], axis=0)                         # (1, Np)
    new_t = traffic_ref[...] + delta                               # (1, Np)
    new_traffic_ref[...] = new_t
    eff_ref[...] = jnp.sum(yield_ref[...] * new_t - cost_ref[...],
                           keepdims=True)                          # (1, 1)


def message_passing_net(edge_index, edge_weight, yield_rate, traffic, cost,
                        *, n, edge_tile=2048):
    """JAX/Pallas equivalent of MessagePassingNet(n).forward(...).

    Returns (new_nodes_traffic (N,), total_service_efficiency scalar)."""
    E = int(edge_index.shape[1])
    N = int(traffic.shape[0])

    # Lane-dense node padding (multiple of 128).  Do NOT pad further: matmuls
    # are M=1, so deeper MXU K buys nothing and only doubles the (Np, TE)
    # one-hot VPU work (the real bottleneck).
    Np = max(128, _round_up(N, 128))

    # Edge tile: multiple of 128, default 2048.  Cap so the (Np, TE) f32
    # one-hot stays <= ~8 MiB so the whole working set (one-hot + double-
    # buffered edge blocks + node rows) fits v7x's 32 MiB scoped VMEM with
    # headroom (v5e/v6e have more; pass edge_tile=1024 on v5e if vst-bound).
    s_t_budget = 8 * 1024 * 1024
    max_te = max(128, (s_t_budget // (4 * Np)) // 128 * 128)
    E_eff = max(E, 1)
    TE = min(_round_up(max(edge_tile, 128), 128),
             _round_up(E_eff, 128),
             max_te)

    num_tiles = _cdiv(E_eff, TE)
    # Leading "parallel" axis: lets v7x's two TensorCores each take half the
    # edge range (harmless on single-core v5e/v6e).
    num_splits = 2 if num_tiles >= 2 else 1
    tiles_per_split = _cdiv(num_tiles, num_splits)
    E_pad = num_splits * tiles_per_split * TE

    # Pack edge data lane-dense: indices (2, E_pad) int32, weights (1, E_pad).
    # Padded edges: src = dst = 0, w = 0 -> zero contribution.
    idx = jnp.zeros((2, E_pad), jnp.int32)
    idx = idx.at[:, :E].set(jnp.asarray(edge_index, jnp.int32))
    w = jnp.zeros((1, E_pad), jnp.float32)
    w = w.at[0, :E].set(jnp.asarray(edge_weight, jnp.float32))

    # Node vectors padded with zeros (padded lanes contribute 0 everywhere).
    traffic_r = jnp.zeros((1, Np), jnp.float32)
    traffic_r = traffic_r.at[0, :N].set(jnp.asarray(traffic, jnp.float32))
    yield_r = jnp.zeros((1, Np), jnp.float32)
    yield_r = yield_r.at[0, :N].set(jnp.asarray(yield_rate, jnp.float32))
    cost_r = jnp.zeros((1, Np), jnp.float32)
    cost_r = cost_r.at[0, :N].set(jnp.asarray(cost, jnp.float32))

    kernel = functools.partial(_edge_scatter_kernel, n=float(n))

    def edge_block(s, t):
        return (0, s * tiles_per_split + t)

    grid_spec = pltpu.PrefetchScalarGridSpec(
        num_scalar_prefetch=0,
        grid=(num_splits, tiles_per_split),
        in_specs=[
            pl.BlockSpec((2, TE), edge_block),             # edge indices
            pl.BlockSpec((1, TE), edge_block),             # edge weights
            pl.BlockSpec((1, Np), lambda s, t: (0, 0)),    # traffic (resident)
        ],
        out_specs=pl.BlockSpec((1, 1, Np), lambda s, t: (s, 0, 0)),
    )

    cost_est = pl.CostEstimate(
        flops=4 * E_pad * Np,            # two (1|Np, Np|TE)-class matmuls
        transcendentals=0,
        bytes_accessed=3 * E_pad * 4 + (1 + num_splits) * Np * 4,
    )

    partial_delta = pl.pallas_call(
        kernel,
        out_shape=jax.ShapeDtypeStruct((num_splits, 1, Np), jnp.float32),
        grid_spec=grid_spec,
        compiler_params=pltpu.CompilerParams(
            dimension_semantics=("parallel", "arbitrary"),
            vmem_limit_bytes=32 * 1024 * 1024),
        cost_estimate=cost_est,
    )(idx, w, traffic_r)

    # Tiny finalize: combine per-core partials, add base traffic, efficiency.
    new_traffic_p, eff = pl.pallas_call(
        _finalize_kernel,
        out_shape=(
            jax.ShapeDtypeStruct((1, Np), jnp.float32),
            jax.ShapeDtypeStruct((1, 1), jnp.float32),
        ),
        grid_spec=pltpu.PrefetchScalarGridSpec(
            num_scalar_prefetch=0,
            grid=(1,),
            in_specs=[
                pl.BlockSpec((num_splits, 1, Np), lambda i: (0, 0, 0)),
                pl.BlockSpec((1, Np), lambda i: (0, 0)),
                pl.BlockSpec((1, Np), lambda i: (0, 0)),
                pl.BlockSpec((1, Np), lambda i: (0, 0)),
            ],
            out_specs=(
                pl.BlockSpec((1, Np), lambda i: (0, 0)),
                pl.BlockSpec((1, 1), lambda i: (0, 0)),
            ),
        ),
    )(partial_delta, traffic_r, yield_r, cost_r)

    return new_traffic_p[0, :N], eff[0, 0]


def _torch_loop_reference(edge_index, edge_weight, yield_rate, traffic, cost,
                          n):
    """NumPy transcription of the original torch edge loop (verification)."""
    new_t = traffic.astype(np.float64).copy()
    E = edge_index.shape[1]
    for i in range(E):
        s = int(edge_index[0, i])
        d = int(edge_index[1, i])
        w = float(edge_weight[i])
        diff = float(traffic[s]) - float(traffic[d])
        if diff > 0:
            tr = diff * n * w
            new_t[s] -= tr
            new_t[d] += tr
        elif diff < 0:
            tr = diff * n * w
            new_t[s] += tr
            new_t[d] -= tr
    eff = float(np.sum(yield_rate.astype(np.float64) * new_t
                       - cost.astype(np.float64)))
    return new_t.astype(np.float32), np.float32(eff)


if __name__ == "__main__":
    key = jax.random.PRNGKey(0)
    k1, k2, k3, k4, k5, k6, k_big = jax.random.split(key, 7)

    # ---- Test 1: tiny graph, mirroring the torch module's dict-based setup.
    N_NODES = 8
    N_EDGES = 16
    PENALTY_N = 0.05  # the module's penalty coefficient `n`

    all_index_node_map = {i: f"node_{i}" for i in range(N_NODES)}
    yield_vals = jax.random.uniform(k1, (N_NODES,), jnp.float32, 0.1, 1.0)
    traffic_vals = jax.random.uniform(k2, (N_NODES,), jnp.float32, 1.0, 10.0)
    cost_vals = jax.random.uniform(k3, (N_NODES,), jnp.float32, 0.1, 2.0)
    nodes_yield_rate_map = {all_index_node_map[i]: float(yield_vals[i])
                            for i in range(N_NODES)}
    nodes_traffic_map = {all_index_node_map[i]: float(traffic_vals[i])
                         for i in range(N_NODES)}
    nodes_cost_map = {all_index_node_map[i]: float(cost_vals[i])
                      for i in range(N_NODES)}

    src_idx = jax.random.randint(k4, (N_EDGES,), 0, N_NODES, jnp.int32)
    dst_idx = jax.random.randint(k5, (N_EDGES,), 0, N_NODES, jnp.int32)
    edge_index = jnp.stack([src_idx, dst_idx], axis=0)            # (2, E)
    edge_weight = jax.random.uniform(k6, (N_EDGES,), jnp.float32, 0.0, 1.0)

    # Build node tensors from the maps exactly as the torch forward does.
    yield_rate = jnp.array([nodes_yield_rate_map[all_index_node_map[i]]
                            for i in range(N_NODES)], jnp.float32)
    traffic = jnp.array([nodes_traffic_map[all_index_node_map[i]]
                         for i in range(N_NODES)], jnp.float32)
    cost = jnp.array([nodes_cost_map[all_index_node_map[i]]
                      for i in range(N_NODES)], jnp.float32)

    new_traffic, total_eff = message_passing_net(
        edge_index, edge_weight, yield_rate, traffic, cost, n=PENALTY_N)
    jax.block_until_ready((new_traffic, total_eff))

    ref_traffic, ref_eff = _torch_loop_reference(
        np.asarray(edge_index), np.asarray(edge_weight),
        np.asarray(yield_rate), np.asarray(traffic), np.asarray(cost),
        PENALTY_N)
    np.testing.assert_allclose(np.asarray(new_traffic), ref_traffic,
                               rtol=1e-5, atol=1e-5)
    np.testing.assert_allclose(float(total_eff), float(ref_eff),
                               rtol=1e-5, atol=1e-5)

    # ---- Test 2: larger graph exercising multiple edge tiles, the 2-way
    # core split and self-loop edges.
    kb1, kb2, kb3, kb4, kb5, kb6 = jax.random.split(k_big, 6)
    N2, E2 = 100, 3000
    yield2 = jax.random.uniform(kb1, (N2,), jnp.float32, 0.1, 1.0)
    traffic2 = jax.random.uniform(kb2, (N2,), jnp.float32, 1.0, 10.0)
    cost2 = jax.random.uniform(kb3, (N2,), jnp.float32, 0.1, 2.0)
    src2 = jax.random.randint(kb4, (E2,), 0, N2, jnp.int32)
    dst2 = jax.random.randint(kb5, (E2,), 0, N2, jnp.int32)
    edge_index2 = jnp.stack([src2, dst2], axis=0)
    edge_weight2 = jax.random.uniform(kb6, (E2,), jnp.float32, 0.0, 1.0)

    new2, eff2 = message_passing_net(edge_index2, edge_weight2, yield2,
                                     traffic2, cost2, n=PENALTY_N)
    jax.block_until_ready((new2, eff2))

    ref2_t, ref2_e = _torch_loop_reference(
        np.asarray(edge_index2), np.asarray(edge_weight2),
        np.asarray(yield2), np.asarray(traffic2), np.asarray(cost2),
        PENALTY_N)
    np.testing.assert_allclose(np.asarray(new2), ref2_t, rtol=1e-3, atol=1e-3)
    np.testing.assert_allclose(float(eff2), float(ref2_e),
                               rtol=1e-3, atol=1e-2)

    print("KERNEL_OK")
</pallas_src>

<mosaic_0001>
module attributes {stable_mosaic.version = 11 : i64} {
  func.func @_edge_scatter_kernel(%arg0: i32, %arg1: i32, %arg2: memref<2x128xi32, #tpu.memory_space<vmem>>, %arg3: memref<1x128xf32, #tpu.memory_space<vmem>>, %arg4: memref<1x128xf32, #tpu.memory_space<vmem>>, %arg5: memref<1x1x128xf32, #tpu.memory_space<vmem>>) attributes {dimension_semantics = [#tpu.dimension_semantics<parallel>, #tpu.dimension_semantics<arbitrary>], iteration_bounds = array<i64: 1, 1>, scalar_prefetch = 0 : i64, scratch_operands = 0 : i64, tpu.core_type = #tpu.core_type<tc>, window_params = [{transform_indices = @transform_0, window_bounds = array<i64: 2, 128>}, {transform_indices = @transform_1, window_bounds = array<i64: 1, 128>}, {pipeline_mode = #tpu.pipeline_mode<synchronous>, transform_indices = @transform_2, window_bounds = array<i64: 1, 128>}, {transform_indices = @transform_3, window_bounds = array<i64: 1, 1, 128>}]} {
    %c0_i32 = arith.constant 0 : i32
    %0 = arith.cmpi eq, %arg1, %c0_i32 : i32
    %1 = arith.extui %0 : i1 to i32
    %c0_i32_0 = arith.constant 0 : i32
    %2 = arith.cmpi ne, %1, %c0_i32_0 : i32
    scf.if %2 {
      %cst_19 = arith.constant 0.000000e+00 : f32
      %32 = vector.broadcast %cst_19 : f32 to vector<1x1x128xf32>
      %c0_20 = arith.constant 0 : index
      %c0_21 = arith.constant 0 : index
      %c0_22 = arith.constant 0 : index
      %33 = vector.load %arg5[%c0_20, %c0_21, %c0_22] : memref<1x1x128xf32, #tpu.memory_space<vmem>>, vector<1x1x128xf32>
      tpu.vector_store %arg5[%c0_20, %c0_21, %c0_22], %32 {strides = array<i32>} : memref<1x1x128xf32, #tpu.memory_space<vmem>>, vector<1x1x128xf32>,
    } else {
    }
    %c0 = arith.constant 0 : index
    %c0_1 = arith.constant 0 : index
    %3 = vector.load %arg2[%c0, %c0_1] : memref<2x128xi32, #tpu.memory_space<vmem>>, vector<1x128xi32>
    %c1 = arith.constant 1 : index
    %c0_2 = arith.constant 0 : index
    %4 = vector.load %arg2[%c1, %c0_2] : memref<2x128xi32, #tpu.memory_space<vmem>>, vector<1x128xi32>
    %c0_3 = arith.constant 0 : index
    %c0_4 = arith.constant 0 : index
    %5 = vector.load %arg3[%c0_3, %c0_4] : memref<1x128xf32, #tpu.memory_space<vmem>>, vector<1x128xf32>
    %6 = tpu.iota {dimensions = array<i32: 0>} : vector<128x128xi32>
    %7 = vector.broadcast %3 : vector<1x128xi32> to vector<128x128xi32>
    %8 = arith.cmpi eq, %6, %7 : vector<128x128xi32>
    %9 = vector.broadcast %4 : vector<1x128xi32> to vector<128x128xi32>
    %10 = arith.cmpi eq, %6, %9 : vector<128x128xi32>
    %cst = arith.constant -1.000000e+00 : f32
    %cst_5 = arith.constant 0.000000e+00 : f32
    %11 = vector.broadcast %cst : f32 to vector<128x128xf32>
    %12 = vector.broadcast %cst_5 : f32 to vector<128x128xf32>
    %13 = arith.select %10, %11, %12 : vector<128x128xi1>, vector<128x128xf32>
    %cst_6 = arith.constant 1.000000e+00 : f32
    %14 = vector.broadcast %cst_6 : f32 to vector<128x128xf32>
    %15 = arith.select %8, %14, %13 : vector<128x128xi1>, vector<128x128xf32>
    %c0_7 = arith.constant 0 : index
    %c0_8 = arith.constant 0 : index
    %16 = vector.load %arg4[%c0_7, %c0_8] : memref<1x128xf32, #tpu.memory_space<vmem>>, vector<1x128xf32>
    %cst_9 = arith.constant dense<0.000000e+00> : vector<1x128xf32>
    %17 = tpu.matmul %16, %15, %cst_9 {dimension_numbers = #tpu.dot_dimension_numbers<[1], [0], [0], [1], [0, 0, 1, 1], [], []>} : vector<1x128xf32>, vector<128x128xf32>, vector<1x128xf32> -> vector<1x128xf32>
    %18 = arith.cmpi ne, %3, %4 : vector<1x128xi32>
    %19 = math.absf %17 : vector<1x128xf32>
    %cst_10 = arith.constant 5.000000e-02 : f32
    %20 = vector.broadcast %cst_10 : f32 to vector<1x128xf32>
    %21 = arith.mulf %5, %20 : vector<1x128xf32>
    %22 = arith.mulf %19, %21 : vector<1x128xf32>
    %cst_11 = arith.constant 0.000000e+00 : f32
    %23 = vector.broadcast %cst_11 : f32 to vector<1x128xf32>
    %24 = arith.select %18, %22, %23 : vector<1x128xi1>, vector<1x128xf32>
    %25 = tpu.transpose %24, [1, 0] : vector<1x128xf32> -> vector<128x1xf32>
    %cst_12 = arith.constant dense<0.000000e+00> : vector<128x1xf32>
    %26 = tpu.matmul %15, %25, %cst_12 {dimension_numbers = #tpu.dot_dimension_numbers<[1], [0], [0], [1], [0, 0, 1, 1], [], []>} : vector<128x128xf32>, vector<128x1xf32>, vector<128x1xf32> -> vector<128x1xf32>
    %c0_13 = arith.constant 0 : index
    %c0_14 = arith.constant 0 : index
    %c0_15 = arith.constant 0 : index
    %27 = vector.load %arg5[%c0_13, %c0_14, %c0_15] : memref<1x1x128xf32, #tpu.memory_space<vmem>>, vector<1x1x128xf32>
    %28 = tpu.transpose %26, [1, 0] : vector<128x1xf32> -> vector<1x128xf32>
    %29 = vector.shape_cast %28 : vector<1x128xf32> to vector<1x1x128xf32>
    %30 = arith.subf %27, %29 : vector<1x1x128xf32>
    %c0_16 = arith.constant 0 : index
    %c0_17 = arith.constant 0 : index
    %c0_18 = arith.constant 0 : index
    %31 = vector.load %arg5[%c0_16, %c0_17, %c0_18] : memref<1x1x128xf32, #tpu.memory_space<vmem>>, vector<1x1x128xf32>
    tpu.vector_store %arg5[%c0_16, %c0_17, %c0_18], %30 {strides = array<i32>} : memref<1x1x128xf32, #tpu.memory_space<vmem>>, vector<1x1x128xf32>,
    return
  }
  func.func @transform_0(%arg0: i32, %arg1: i32) -> (i32, i32) {
    %c1_i32 = arith.constant 1 : i32
    %0 = arith.muli %arg0, %c1_i32 : i32
    %1 = arith.addi %0, %arg1 : i32
    %c0_i32 = arith.constant 0 : i32
    %c0_i32_0 = arith.constant 0 : i32
    return %c0_i32, %1 : i32, i32
  }
  func.func @transform_1(%arg0: i32, %arg1: i32) -> (i32, i32) {
    %c1_i32 = arith.constant 1 : i32
    %0 = arith.muli %arg0, %c1_i32 : i32
    %1 = arith.addi %0, %arg1 : i32
    %c0_i32 = arith.constant 0 : i32
    %c0_i32_0 = arith.constant 0 : i32
    return %c0_i32, %1 : i32, i32
  }
  func.func @transform_2(%arg0: i32, %arg1: i32) -> (i32, i32) {
    %c0_i32 = arith.constant 0 : i32
    %c0_i32_0 = arith.constant 0 : i32
    %c0_i32_1 = arith.constant 0 : i32
    return %c0_i32, %c0_i32_0 : i32, i32
  }
  func.func @transform_3(%arg0: i32, %arg1: i32) -> (i32, i32, i32) {
    %c0_i32 = arith.constant 0 : i32
    %c0_i32_0 = arith.constant 0 : i32
    %c0_i32_1 = arith.constant 0 : i32
    return %arg0, %c0_i32, %c0_i32_0 : i32, i32, i32
  }
}

</mosaic_0001>

<bundles_post_ra>
// kernel: tpu_custom_call.1
= control target key start
LH: loop header
LB: loop body
LE: loop exit
PB: predicated region body
PF: predicated region fallthrough
CT: control target
= control target key end

     0   :  { %8 = vsyncpa [#allocation3], 0  ;;  %s598_s0 = inlined_call_operand.hbm [shape: s32[2,128], index: 0, kind: input, shape index: {}]   ;;  %s599_s1 = inlined_call_operand.vmem [shape: f32[1,128], index: 1, kind: input, shape index: {}]   ;;  %s600_s2 = inlined_call_operand.vmem [shape: f32[1,128], index: 2, kind: input, shape index: {}]   ;;  %s601_s3 = inlined_call_operand.hbm [shape: f32[1,1,128], index: 3, kind: output, shape index: {}]  }
   0x1   :  { %9 = vsyncpa [#allocation4], 0  ;;  %s423_s12 = smov [#allocation2]  }
   0x2   :  { %s19_s13 = sshll.u32 %s423_s12, 4  ;;  %s20_s13 = int_to_ptr.vmem [resolvable:$true] %s19_s13 }
   0x3   :  { %s387_s14 = scalar_lea.vmem %s20_s13, 32  ;;  %p392_p1 = scmp.lt.s32.totalorder %s20_s13, %s20_s13 }
   0x4   :  { %p388_p0 = scmp.ne.s32.totalorder %s20_s13, %s387_s14  ;;  %p393_p2 = scmp.lt.s32.totalorder %s387_s14, %s387_s14 }
   0x6   :  { %p394_p3 = por %p393_p2, %p392_p1 }
   0x8   :  { %p395_p4 = pnand %p394_p3, %p388_p0 }
   0xa   :  { %398 = shalt.err (!%p395_p4)
}
   0xb   :  { %22 = dma.hbm_to_vmem [thread:$0]  %s598_s0, 32, %s20_s13, [#allocation3]  }
   0xc   :  { %419 = dma.done.wait [#allocation3], 32  }
   0xd   :  { %420 = vsyncadd [#allocation3], 4294967264  ;;  %v53_v0 = vlaneseq  ;;  %v424_v1 = vmov 0.0   ;;  %vm425_vm0 = vmmov 0   ;;  %v460_v6 = vld [vmem:[#allocation2] sm:$0x1] }
   0xe   :  { %49 = vst [vmem:[#allocation5] sm:$0x1] %v424_v1  ;;  %340 = vmatprep.subr.mxu0 %v424_v1  ;;  %372 = vmatprep.mubr.msk.f32.mxu0 %vm425_vm0, %v424_v1  ;;  %v462_v7 = vld [vmem:[#allocation2 + $0x1] sm:$0x1]  ;;  %v142_v55 = vld [vmem:[%s600_s2] sm:$0x1] }
   0xf   :  { %v453_v2 = vshrl.u32 %v53_v0, 7  ;;  %v52_v56 = vld [vmem:[%s599_s1] sm:$0x1]  ;;  %s426_s1 = smov [#allocation5]  }
  0x10   :  { %v215_v57 = vmul.f32 0.05, %v52_v56  ;;  %s311_s2 = sshll.u32 %s426_s1, 4  ;;  %s312_s2 = int_to_ptr.vmem [resolvable:$true] %s311_s2 }
  0x11   :  { %v456_v3 = vsub.s32 0, %v453_v2  ;;  %v69_v4 = vadd.s32 120, %v453_v2  ;;  %v68_v5 = vadd.s32 112, %v453_v2  ;;  %v67_v8 = vadd.s32 104, %v453_v2  ;;  %s399_s20 = scalar_lea.vmem %s312_s2, 16  ;;  %s403_s21 = scalar_lea.vmem %s312_s2, 32 }
  0x12   :  { %v66_v11 = vadd.s32 96, %v453_v2  ;;  %v65_v12 = vadd.s32 88, %v453_v2  ;;  %v64_v13 = vadd.s32 80, %v453_v2  ;;  %v63_v19 = vadd.s32 72, %v453_v2  ;;  %p400_p5 = scmp.ne.s32.totalorder %s312_s2, %s399_s20  ;;  %p404_p6 = scmp.lt.s32.totalorder %s312_s2, %s312_s2 }
  0x13   :  { %v467_v9 = vrot.slane %v460_v6, %v456_v3  ;;  %v471_v10 = vrot.slane %v462_v7, %v456_v3  ;;  %v62_v22 = vadd.s32 64, %v453_v2  ;;  %v61_v25 = vadd.s32 56, %v453_v2  ;;  %p405_p7 = scmp.lt.s32.totalorder %s403_s21, %s399_s20 }
  0x14   :  { %v60_v28 = vadd.s32 48, %v453_v2  ;;  %v59_v31 = vadd.s32 40, %v453_v2  ;;  %v58_v34 = vadd.s32 32, %v453_v2  ;;  %v57_v37 = vadd.s32 24, %v453_v2 }
  0x15   :  { %vm89_vm1 = vcmp.eq.s32.totalorder %v69_v4, %v467_v9  ;;  %vm109_vm2 = vcmp.eq.s32.totalorder %v69_v4, %v471_v10  ;;  %vm88_vm3 = vcmp.eq.s32.totalorder %v68_v5, %v467_v9  ;;  %vm108_vm4 = vcmp.eq.s32.totalorder %v68_v5, %v471_v10  ;;  %p406_p8 = por %p405_p7, %p404_p6 }
  0x16   :  { %v125_v14 = vsel %vm109_vm2, -1.0, %v424_v1  ;;  %v124_v15 = vsel %vm108_vm4, -1.0, %v424_v1  ;;  %vm87_vm5 = vcmp.eq.s32.totalorder %v67_v8, %v467_v9  ;;  %vm107_vm6 = vcmp.eq.s32.totalorder %v67_v8, %v471_v10 }
  0x17   :  { %v484_v16 = vsel %vm89_vm1, 1.0, %v125_v14  ;;  %v486_v17 = vsel %vm88_vm3, 1.0, %v124_v15  ;;  %v123_v18 = vsel %vm107_vm6, -1.0, %v424_v1  ;;  %vm86_vm7 = vcmp.eq.s32.totalorder %v66_v11, %v467_v9  ;;  %p407_p9 = pnand %p406_p8, %p400_p5 }
  0x18   :  { %341 = vmatpush3.msra.mxu0 %v484_v16  ;;  %vm106_vm8 = vcmp.eq.s32.totalorder %v66_v11, %v471_v10  ;;  %vm105_vm9 = vcmp.eq.s32.totalorder %v65_v12, %v471_v10  ;;  %v495_v20 = vsel %vm87_vm5, 1.0, %v123_v18  ;;  %vm104_vm10 = vcmp.eq.s32.totalorder %v64_v13, %v471_v10 }
  0x19   :  { %342 = vmatprep.subr.mxu0 %v424_v1  ;;  %v122_v21 = vsel %vm106_vm8, -1.0, %v424_v1  ;;  %vm85_vm11 = vcmp.eq.s32.totalorder %v65_v12, %v467_v9  ;;  %v121_v23 = vsel %vm105_vm9, -1.0, %v424_v1  ;;  %vm103_vm12 = vcmp.eq.s32.totalorder %v63_v19, %v471_v10 }
  0x1a   :  { %343 = vmatpush3.msra.mxu0 %v486_v17  ;;  %v504_v24 = vsel %vm86_vm7, 1.0, %v122_v21  ;;  %vm84_vm13 = vcmp.eq.s32.totalorder %v64_v13, %v467_v9  ;;  %v120_v26 = vsel %vm104_vm10, -1.0, %v424_v1  ;;  %v512_v27 = vsel %vm85_vm11, 1.0, %v121_v23 }
  0x1b   :  { %344 = vmatprep.subr.mxu0 %v424_v1  ;;  %vm102_vm14 = vcmp.eq.s32.totalorder %v62_v22, %v471_v10  ;;  %vm83_vm15 = vcmp.eq.s32.totalorder %v63_v19, %v467_v9  ;;  %v119_v29 = vsel %vm103_vm12, -1.0, %v424_v1  ;;  %v520_v30 = vsel %vm84_vm13, 1.0, %v120_v26 }
  0x1c   :  { %345 = vmatpush3.msra.mxu0 %v495_v20  ;;  %vm101_vm0 = vcmp.eq.s32.totalorder %v61_v25, %v471_v10  ;;  %vm82_vm1 = vcmp.eq.s32.totalorder %v62_v22, %v467_v9  ;;  %v118_v32 = vsel %vm102_vm14, -1.0, %v424_v1  ;;  %v528_v33 = vsel %vm83_vm15, 1.0, %v119_v29 }
  0x1d   :  { %346 = vmatprep.subr.mxu0 %v424_v1  ;;  %vm100_vm2 = vcmp.eq.s32.totalorder %v60_v28, %v471_v10  ;;  %vm81_vm3 = vcmp.eq.s32.totalorder %v61_v25, %v467_v9  ;;  %v117_v35 = vsel %vm101_vm0, -1.0, %v424_v1  ;;  %v536_v36 = vsel %vm82_vm1, 1.0, %v118_v32  ;;  %v270_v32 = vld [vmem:[#allocation5] sm:$0x1] }
  0x1e   :  { %347 = vmatpush3.msra.mxu0 %v504_v24  ;;  %vm99_vm4 = vcmp.eq.s32.totalorder %v59_v31, %v471_v10  ;;  %vm80_vm5 = vcmp.eq.s32.totalorder %v60_v28, %v467_v9  ;;  %v116_v38 = vsel %vm100_vm2, -1.0, %v424_v1  ;;  %v544_v39 = vsel %vm81_vm3, 1.0, %v117_v35 }
  0x1f   :  { %348 = vmatprep.subr.mxu0 %v424_v1  ;;  %vm98_vm6 = vcmp.eq.s32.totalorder %v58_v34, %v471_v10  ;;  %v56_v40 = vadd.s32 16, %v453_v2  ;;  %vm79_vm7 = vcmp.eq.s32.totalorder %v59_v31, %v467_v9  ;;  %v115_v41 = vsel %vm99_vm4, -1.0, %v424_v1 }
  0x20   :  { %349 = vmatpush3.msra.mxu0 %v512_v27  ;;  %v132_v42 = vsel %vm80_vm5, 1.0, %v116_v38  ;;  %vm97_vm8 = vcmp.eq.s32.totalorder %v57_v37, %v471_v10  ;;  %v55_v43 = vadd.s32 8, %v453_v2  ;;  %vm78_vm9 = vcmp.eq.s32.totalorder %v58_v34, %v467_v9 }
  0x21   :  { %350 = vmatprep.subr.mxu0 %v424_v1  ;;  %v114_v44 = vsel %vm98_vm6, -1.0, %v424_v1  ;;  %v131_v45 = vsel %vm79_vm7, 1.0, %v115_v41  ;;  %vm96_vm10 = vcmp.eq.s32.totalorder %v56_v40, %v471_v10  ;;  %vm77_vm11 = vcmp.eq.s32.totalorder %v57_v37, %v467_v9 }
  0x22   :  { %351 = vmatpush3.msra.mxu0 %v520_v30  ;;  %v113_v46 = vsel %vm97_vm8, -1.0, %v424_v1  ;;  %v130_v47 = vsel %vm78_vm9, 1.0, %v114_v44  ;;  %vm95_vm12 = vcmp.eq.s32.totalorder %v55_v43, %v471_v10  ;;  %vm76_vm13 = vcmp.eq.s32.totalorder %v56_v40, %v467_v9 }
  0x23   :  { %352 = vmatprep.subr.mxu0 %v424_v1  ;;  %v112_v48 = vsel %vm96_vm10, -1.0, %v424_v1  ;;  %v129_v49 = vsel %vm77_vm11, 1.0, %v113_v46  ;;  %vm94_vm14 = vcmp.eq.s32.totalorder %v453_v2, %v471_v10  ;;  %vm75_vm15 = vcmp.eq.s32.totalorder %v55_v43, %v467_v9 }
  0x24   :  { %353 = vmatpush3.msra.mxu0 %v528_v33  ;;  %v111_v50 = vsel %vm95_vm12, -1.0, %v424_v1  ;;  %v128_v51 = vsel %vm76_vm13, 1.0, %v112_v48  ;;  %vm74_vm0 = vcmp.eq.s32.totalorder %v453_v2, %v467_v9  ;;  %v110_v52 = vsel %vm94_vm14, -1.0, %v424_v1 }
  0x25   :  { %354 = vmatprep.subr.mxu0 %v424_v1  ;;  %v127_v53 = vsel %vm75_vm15, 1.0, %v111_v50  ;;  %v126_v54 = vsel %vm74_vm0, 1.0, %v110_v52  ;;  %vm213_vm1 = vcmp.ne.s32.totalorder %v460_v6, %v462_v7 }
  0x26   :  { %355 = vmatpush3.msra.mxu0 %v536_v36 }
  0x27   :  { %356 = vmatprep.subr.mxu0 %v424_v1 }
  0x28   :  { %357 = vmatpush3.msra.mxu0 %v544_v39 }
  0x29   :  { %358 = vmatprep.subr.mxu0 %v424_v1 }
  0x2a   :  { %359 = vmatpush3.msra.mxu0 %v132_v42 }
  0x2b   :  { %360 = vmatprep.subr.mxu0 %v424_v1 }
  0x2c   :  { %361 = vmatpush3.msra.mxu0 %v131_v45 }
  0x2d   :  { %362 = vmatprep.subr.mxu0 %v424_v1 }
  0x2e   :  { %363 = vmatpush3.msra.mxu0 %v130_v47 }
  0x2f   :  { %364 = vmatprep.subr.mxu0 %v424_v1 }
  0x30   :  { %365 = vmatpush3.msra.mxu0 %v129_v49 }
  0x31   :  { %366 = vmatprep.subr.mxu0 %v424_v1 }
  0x32   :  { %367 = vmatpush3.msra.mxu0 %v128_v51 }
  0x33   :  { %368 = vmatprep.subr.mxu0 %v424_v1 }
  0x34   :  { %369 = vmatpush3.msra.mxu0 %v127_v53 }
  0x35   :  { %370 = vmatprep.subr.mxu0 %v424_v1 }
  0x36   :  { %371 = vmatpush3.msra.mxu0 %v126_v54 }
  0x37   :  { %373 = vmatmul.mubr.f32.vlgmr.msra.gmra.mxu0 %v142_v55 }
  0xf7   :  { %v209_v58 = vpop.f32.mrf.mxu0 }
  0xf8   :  { %v214_v59 = vand.u32 2147483647, %v209_v58 }
  0xf9   :  { %v374_v60 = vpop.f32.mrf.mxu0 }
  0xfa   :  { %v216_v61 = vmul.f32 %v215_v57, %v214_v59 }
  0xfc   :  { %v217_v62 = vsel %vm213_vm1, %v216_v61, 0.0 }
  0xfd   :  { %v221_v63 = vrot.slane %v217_v62, %v456_v3 }
  0xff   :  { %v224_v0 = vmul.f32 %v221_v63, %v128_v51  ;;  %v222_v2 = vmul.f32 %v221_v63, %v126_v54  ;;  %v225_v1 = vmul.f32 %v221_v63, %v129_v49  ;;  %v223_v4 = vmul.f32 %v221_v63, %v127_v53 }
 0x100   :  { %v227_v5 = vmul.f32 %v221_v63, %v131_v45  ;;  %v226_v8 = vmul.f32 %v221_v63, %v130_v47  ;;  %v229_v9 = vmul.f32 %v221_v63, %v544_v39  ;;  %v228_v6 = vmul.f32 %v221_v63, %v132_v42 }
 0x101   :  { %242 = vadd.xlane.f32.xlu1 %v224_v0  ;;  %238 = vadd.xlane.f32.xlu0 %v222_v2  ;;  %v231_v7 = vmul.f32 %v221_v63, %v528_v33  ;;  %v230_v3 = vmul.f32 %v221_v63, %v536_v36  ;;  %v233_v10 = vmul.f32 %v221_v63, %v512_v27 }
 0x102   :  { %v232_v11 = vmul.f32 %v221_v63, %v520_v30  ;;  %v235_v12 = vmul.f32 %v221_v63, %v495_v20  ;;  %v234_v13 = vmul.f32 %v221_v63, %v504_v24  ;;  %v237_v14 = vmul.f32 %v221_v63, %v484_v16 }
 0x103   :  { %v236_v15 = vmul.f32 %v221_v63, %v486_v17 }
 0x105   :  { %244 = vadd.xlane.f32.xlu1 %v225_v1  ;;  %240 = vadd.xlane.f32.xlu0 %v223_v4 }
 0x109   :  { %248 = vadd.xlane.f32.xlu1 %v227_v5  ;;  %246 = vadd.xlane.f32.xlu0 %v226_v8 }
 0x10d   :  { %252 = vadd.xlane.f32.xlu1 %v229_v9  ;;  %250 = vadd.xlane.f32.xlu0 %v228_v6 }
 0x111   :  { %256 = vadd.xlane.f32.xlu1 %v231_v7  ;;  %254 = vadd.xlane.f32.xlu0 %v230_v3 }
 0x115   :  { %260 = vadd.xlane.f32.xlu1 %v233_v10  ;;  %258 = vadd.xlane.f32.xlu0 %v232_v11 }
 0x119   :  { %264 = vadd.xlane.f32.xlu1 %v235_v12  ;;  %262 = vadd.xlane.f32.xlu0 %v234_v13 }
 0x11d   :  { %268 = vadd.xlane.f32.xlu1 %v237_v14  ;;  %266 = vadd.xlane.f32.xlu0 %v236_v15 }
 0x18a   :  { %v239_v18 = vpop.xlane.xlu0 %238  ;;  %v243_v21 = vpop.xlane.xlu1 %242 }
 0x18b   :  { %271 = vxpose.xlu0.b32.start [1/16] (narrow) %v239_v18, 8 }
 0x18e   :  { %v241_v19 = vpop.xlane.xlu0 %240  ;;  %v245_v22 = vpop.xlane.xlu1 %244 }
 0x18f   :  { %272 = vxpose.xlu0.b32.cont [2/16] (narrow) %v241_v19, 8 }
 0x192   :  { %v247_v23 = vpop.xlane.xlu0 %246  ;;  %v249_v20 = vpop.xlane.xlu1 %248 }
 0x193   :  { %273 = vxpose.xlu0.b32.cont [3/16] (narrow) %v243_v21, 8 }
 0x196   :  { %v251_v24 = vpop.xlane.xlu0 %250  ;;  %v253_v25 = vpop.xlane.xlu1 %252 }
 0x197   :  { %274 = vxpose.xlu0.b32.cont [4/16] (narrow) %v245_v22, 8 }
 0x19a   :  { %v255_v16 = vpop.xlane.xlu0 %254  ;;  %v257_v17 = vpop.xlane.xlu1 %256 }
 0x19b   :  { %275 = vxpose.xlu0.b32.cont [5/16] (narrow) %v247_v23, 8 }
 0x19e   :  { %v259_v26 = vpop.xlane.xlu0 %258  ;;  %v261_v27 = vpop.xlane.xlu1 %260 }
 0x19f   :  { %276 = vxpose.xlu0.b32.cont [6/16] (narrow) %v249_v20, 8 }
 0x1a2   :  { %v263_v28 = vpop.xlane.xlu0 %262  ;;  %v265_v29 = vpop.xlane.xlu1 %264 }
 0x1a3   :  { %277 = vxpose.xlu0.b32.cont [7/16] (narrow) %v251_v24, 8 }
 0x1a6   :  { %v267_v30 = vpop.xlane.xlu0 %266  ;;  %v269_v31 = vpop.xlane.xlu1 %268 }
 0x1a7   :  { %278 = vxpose.xlu0.b32.cont [8/16] (narrow) %v253_v25, 8 }
 0x1ab   :  { %279 = vxpose.xlu0.b32.cont [9/16] (narrow) %v255_v16, 8 }
 0x1af   :  { %280 = vxpose.xlu0.b32.cont [10/16] (narrow) %v257_v17, 8 }
 0x1b3   :  { %281 = vxpose.xlu0.b32.cont [11/16] (narrow) %v259_v26, 8 }
 0x1b7   :  { %282 = vxpose.xlu0.b32.cont [12/16] (narrow) %v261_v27, 8 }
 0x1bb   :  { %283 = vxpose.xlu0.b32.cont [13/16] (narrow) %v263_v28, 8 }
 0x1bf   :  { %284 = vxpose.xlu0.b32.cont [14/16] (narrow) %v265_v29, 8 }
 0x1c3   :  { %285 = vxpose.xlu0.b32.cont [15/16] (narrow) %v267_v30, 8 }
 0x1c7   :  { %286 = vxpose.xlu0.b32.end [16/16] (narrow) %v269_v31, 8 }
 0x207   :  { %v287_v33 = vpop.trf.xlu0 }
 0x208   :  { %v303_v34 = vsub.f32 %v270_v32, %v287_v33 }
 0x20a   :  { %304 = vst [vmem:[#allocation5] sm:$0x1] %v303_v34 }
 0x20b   :  { %410 = shalt.err (!%p407_p9)
}
 0x20c   :  { %314 = dma.vmem_to_hbm [thread:$0]  %s312_s2, 16, %s601_s3, [#allocation4]  }
 0x20d   :  { %421 = dma.done.wait [#allocation4], 16  }
 0x20e   :  { %422 = vsyncadd [#allocation4], 4294967280 }
 0x20f   :  { %318 = vsyncpa [#allocation3], 1 }
 0x210   :  { %319 = vsyncpa [#allocation4], 1 }

</bundles_post_ra>
